<compile_context>
chip_gen: v7x
topology: tpu7x:2x2x1
jax: 0.10.0
libtpu: 0.0.40
codegen_flags: <defaults>
</compile_context>

<pallas_src>
import functools
import math

import jax
import jax.numpy as jnp
from jax.experimental import pallas as pl
from jax.experimental.pallas import tpu as pltpu


# ----------------------------------------------------------------------------
# Fused MHA kernel: one batch element per grid step, all heads per block.
# ----------------------------------------------------------------------------
def _fused_mha_kernel(qx_ref, kx_ref, vx_ref,
                      wq_ref, bq_ref, wk_ref, bk_ref, wv_ref, bv_ref,
                      wo_ref, bo_ref, out_ref,
                      *, n_heads, compute_dtype):
    """Ref shapes (batch dim squeezed by the BlockSpec):
         qx/kx/vx : (S, E)        compute_dtype
         wq/wk/wv : (H, E, D)     compute_dtype, head-major (W_q pre-scaled)
         bq/bk/bv : (H, 1, D)     float32       (b_q pre-scaled)
         wo       : (H, D, E)     compute_dtype
         bo       : (1, E)        float32
         out      : (S, E)
    """
    H = n_heads
    S, E = qx_ref.shape

    def project(x_ref, w_ref, b_ref):
        # (S, E) -> (H, S, D): broadcast x along the head axis and run a batched
        # matmul.  Same FLOPs as (S, E) @ (E, H*D), but lands directly in the
        # head-major layout -- no in-kernel transpose / lane-splitting reshape.
        x = jnp.broadcast_to(x_ref[...][None], (H, S, E))
        y = jnp.einsum("hse,hed->hsd", x, w_ref[...],
                       preferred_element_type=jnp.float32)
        return y + b_ref[...]                                   # (H, S, D) f32

    q = project(qx_ref, wq_ref, bq_ref)   # already carries the 1/sqrt(D) scale
    k = project(kx_ref, wk_ref, bk_ref)
    v = project(vx_ref, wv_ref, bv_ref)

    # Scores: contract the last (D) dims directly -- no explicit .T.
    s = jnp.einsum("hqd,hkd->hqk",
                   q.astype(compute_dtype), k.astype(compute_dtype),
                   preferred_element_type=jnp.float32)          # (H, S, S) f32

    # TODO(synk): attention mask not supported (module's forward passes mask=None).
    # Numerically-stable softmax, kept in f32 regardless of compute_dtype.
    m = jnp.max(s, axis=-1, keepdims=True)
    p = jnp.exp(s - m)
    l = jnp.sum(p, axis=-1, keepdims=True)
    # approx=True would offload the divide to the EUP; exact keeps 1e-4 accuracy.
    p = p * pl.reciprocal(l, approx=False)
    # TODO(synk): attention dropout not applied (module's path uses dropout_p=0.0).

    o = jnp.einsum("hqk,hkd->hqd",
                   p.astype(compute_dtype), v.astype(compute_dtype),
                   preferred_element_type=jnp.float32)          # (H, S, D) f32

    # Fused output projection: per-head partial products, then sum over heads
    # (avoids an (H,S,D) -> (S,H*D) relayout in front of the MXU).
    out_h = jnp.einsum("hsd,hde->hse",
                       o.astype(compute_dtype), wo_ref[...],
                       preferred_element_type=jnp.float32)      # (H, S, E) f32
    out = jnp.sum(out_h, axis=0) + bo_ref[...]                  # (S, E)
    out_ref[...] = out.astype(out_ref.dtype)


# ----------------------------------------------------------------------------
# Forward wrapper
# ----------------------------------------------------------------------------
def mha_forward(params, q_in, k_in, v_in, n_heads, d_qkv,
                compute_dtype=jnp.float32):
    B, S, E = q_in.shape
    H, D = n_heads, d_qkv
    d_inner = H * D
    cdtype = jnp.dtype(compute_dtype)

    w_q, b_q = params["W_q"]
    w_k, b_k = params["W_k"]
    w_v, b_v = params["W_v"]
    w_o, b_o = params["W_o"]

    scale = 1.0 / math.sqrt(D)

    # One-time head-major re-layout of the *parameters* (tiny; replaces any
    # per-call activation transposes).  The softmax scale is folded into the Q
    # projection so the kernel never scales the (H,S,S) score tensor.
    def head_major(w, b, s=1.0):
        w_r = (w * s).reshape(E, H, D).transpose(1, 0, 2).astype(cdtype)  # (H,E,D)
        b_r = (b * s).reshape(H, 1, D).astype(jnp.float32)                # (H,1,D)
        return w_r, b_r

    wq_r, bq_r = head_major(w_q, b_q, scale)
    wk_r, bk_r = head_major(w_k, b_k)
    wv_r, bv_r = head_major(w_v, b_v)
    wo_r = w_o.reshape(H, D, E).astype(cdtype)                            # (H,D,E)
    bo_r = b_o.reshape(1, E).astype(jnp.float32)

    # For the bf16 MXU path the activations are also narrowed host-side,
    # halving the kernel's input DMA bytes; accumulation stays f32 in-kernel.
    qx = q_in.astype(cdtype)
    kx = k_in.astype(cdtype)
    vx = v_in.astype(cdtype)

    kernel = functools.partial(_fused_mha_kernel, n_heads=H,
                               compute_dtype=cdtype)

    act_spec = pl.BlockSpec((None, S, E), lambda b: (b, 0, 0))
    out_spec = pl.BlockSpec((None, S, E), lambda b: (b, 0, 0))
    w_spec = pl.BlockSpec((H, E, D), lambda b: (0, 0, 0))
    bqkv_spec = pl.BlockSpec((H, 1, D), lambda b: (0, 0, 0))
    wo_spec = pl.BlockSpec((H, D, E), lambda b: (0, 0, 0))
    bo_spec = pl.BlockSpec((1, E), lambda b: (0, 0))

    flops = int(B * (6 * S * E * d_inner            # Q/K/V projections
                     + 4 * H * S * S * D            # scores + attn @ V
                     + 2 * S * d_inner * E))        # output projection
    transcendentals = int(B * H * S * S)            # exp in softmax
    act_bytes = cdtype.itemsize
    bytes_accessed = int(3 * B * S * E * act_bytes                      # q/k/v in
                         + B * S * E * q_in.dtype.itemsize              # out
                         + 4 * E * d_inner * act_bytes                  # W_q/k/v/o
                         + 4 * (3 * d_inner + E))                       # biases f32

    return pl.pallas_call(
        kernel,
        out_shape=jax.ShapeDtypeStruct((B, S, E), q_in.dtype),
        grid=(B,),
        in_specs=[act_spec, act_spec, act_spec,
                  w_spec, bqkv_spec, w_spec, bqkv_spec, w_spec, bqkv_spec,
                  wo_spec, bo_spec],
        out_specs=out_spec,
        compiler_params=pltpu.CompilerParams(
            dimension_semantics=("parallel",),
            vmem_limit_bytes=32 * 1024 * 1024,
        ),
        cost_estimate=pl.CostEstimate(
            flops=flops,
            transcendentals=transcendentals,
            bytes_accessed=bytes_accessed,
        ),
    )(qx, kx, vx, wq_r, bq_r, wk_r, bk_r, wv_r, bv_r, wo_r, bo_r)


# ----------------------------------------------------------------------------
# Parameter init (PyTorch nn.Linear style) and pure-JAX reference
# ----------------------------------------------------------------------------
def init_mha_params(key, d_emb, n_heads, d_qkv):
    d_inner = d_qkv * n_heads

    def init_linear(k, fan_in, fan_out):
        kw, kb = jax.random.split(k)
        bound = 1.0 / math.sqrt(fan_in)
        w = jax.random.uniform(kw, (fan_in, fan_out), jnp.float32, -bound, bound)
        b = jax.random.uniform(kb, (fan_out,), jnp.float32, -bound, bound)
        return w, b

    kq, kk, kv, ko = jax.random.split(key, 4)
    return {
        "W_q": init_linear(kq, d_emb, d_inner),
        "W_k": init_linear(kk, d_emb, d_inner),
        "W_v": init_linear(kv, d_emb, d_inner),
        "W_o": init_linear(ko, d_inner, d_emb),
    }


def mha_reference(params, q_in, k_in, v_in, n_heads, d_qkv):
    B, S, d_emb = q_in.shape

    def proj(x, wb):
        w, b = wb
        y = x @ w + b
        return y.reshape(B, S, n_heads, d_qkv).transpose(0, 2, 1, 3)

    q = proj(q_in, params["W_q"])
    k = proj(k_in, params["W_k"])
    v = proj(v_in, params["W_v"])
    s = jnp.einsum("bhqd,bhkd->bhqk", q, k) / math.sqrt(d_qkv)
    p = jax.nn.softmax(s, axis=-1)
    o = jnp.einsum("bhqk,bhkd->bhqd", p, v)
    o = o.transpose(0, 2, 1, 3).reshape(B, S, n_heads * d_qkv)
    w_o, b_o = params["W_o"]
    return o @ w_o + b_o


if __name__ == "__main__":
    # Small shapes consistent with the module:
    # batch=2, seq=8, d_emb=32, n_heads=4, d_qkv=d_emb//n_heads=8, dropout_p=0
    B, S, d_emb, n_heads = 2, 8, 32, 4
    d_qkv = d_emb // n_heads

    key = jax.random.PRNGKey(0)
    kp, kq, kk, kv = jax.random.split(key, 4)
    params = init_mha_params(kp, d_emb, n_heads, d_qkv)

    q_in = jax.random.normal(kq, (B, S, d_emb), jnp.float32)
    k_in = jax.random.normal(kk, (B, S, d_emb), jnp.float32)
    v_in = jax.random.normal(kv, (B, S, d_emb), jnp.float32)

    ref = mha_reference(params, q_in, k_in, v_in, n_heads, d_qkv)

    # Exact (f32 MXU operands) path: must match the reference tightly.
    out = jax.block_until_ready(
        mha_forward(params, q_in, k_in, v_in, n_heads, d_qkv,
                    compute_dtype=jnp.float32))
    assert out.shape == (B, S, d_emb)
    assert jnp.allclose(out, ref, atol=1e-4, rtol=1e-4), "f32 mismatch vs reference"

    # bf16-operand / f32-accumulate path (v6e/v7x MXU peak); looser tolerance.
    out_bf16 = jax.block_until_ready(
        mha_forward(params, q_in, k_in, v_in, n_heads, d_qkv,
                    compute_dtype=jnp.bfloat16))
    assert jnp.allclose(out_bf16, ref, atol=5e-2, rtol=5e-2), "bf16 mismatch vs reference"

    print("KERNEL_OK")
</pallas_src>

<mosaic_0001>
module attributes {stable_mosaic.version = 11 : i64} {
  func.func @_fused_mha_kernel(%arg0: i32, %arg1: memref<1x8x32xf32, #tpu.memory_space<vmem>>, %arg2: memref<1x8x32xf32, #tpu.memory_space<vmem>>, %arg3: memref<1x8x32xf32, #tpu.memory_space<vmem>>, %arg4: memref<4x32x8xf32, #tpu.memory_space<vmem>>, %arg5: memref<4x1x8xf32, #tpu.memory_space<vmem>>, %arg6: memref<4x32x8xf32, #tpu.memory_space<vmem>>, %arg7: memref<4x1x8xf32, #tpu.memory_space<vmem>>, %arg8: memref<4x32x8xf32, #tpu.memory_space<vmem>>, %arg9: memref<4x1x8xf32, #tpu.memory_space<vmem>>, %arg10: memref<4x8x32xf32, #tpu.memory_space<vmem>>, %arg11: memref<1x32xf32, #tpu.memory_space<vmem>>, %arg12: memref<1x8x32xf32, #tpu.memory_space<vmem>>) attributes {dimension_semantics = [#tpu.dimension_semantics<parallel>], iteration_bounds = array<i64: 2>, scalar_prefetch = 0 : i64, scratch_operands = 0 : i64, tpu.core_type = #tpu.core_type<tc>, window_params = [{transform_indices = @transform_0, window_bounds = array<i64: 1, 8, 32>}, {transform_indices = @transform_1, window_bounds = array<i64: 1, 8, 32>}, {transform_indices = @transform_2, window_bounds = array<i64: 1, 8, 32>}, {pipeline_mode = #tpu.pipeline_mode<synchronous>, transform_indices = @transform_3, window_bounds = array<i64: 4, 32, 8>}, {pipeline_mode = #tpu.pipeline_mode<synchronous>, transform_indices = @transform_4, window_bounds = array<i64: 4, 1, 8>}, {pipeline_mode = #tpu.pipeline_mode<synchronous>, transform_indices = @transform_5, window_bounds = array<i64: 4, 32, 8>}, {pipeline_mode = #tpu.pipeline_mode<synchronous>, transform_indices = @transform_6, window_bounds = array<i64: 4, 1, 8>}, {pipeline_mode = #tpu.pipeline_mode<synchronous>, transform_indices = @transform_7, window_bounds = array<i64: 4, 32, 8>}, {pipeline_mode = #tpu.pipeline_mode<synchronous>, transform_indices = @transform_8, window_bounds = array<i64: 4, 1, 8>}, {pipeline_mode = #tpu.pipeline_mode<synchronous>, transform_indices = @transform_9, window_bounds = array<i64: 4, 8, 32>}, {pipeline_mode = #tpu.pipeline_mode<synchronous>, transform_indices = @transform_10, window_bounds = array<i64: 1, 32>}, {transform_indices = @transform_11, window_bounds = array<i64: 1, 8, 32>}]} {
    %c0 = arith.constant 0 : index
    %c0_0 = arith.constant 0 : index
    %c0_1 = arith.constant 0 : index
    %0 = vector.load %arg1[%c0, %c0_0, %c0_1] : memref<1x8x32xf32, #tpu.memory_space<vmem>>, vector<1x8x32xf32>
    %1 = vector.shape_cast %0 : vector<1x8x32xf32> to vector<8x32xf32>
    %2 = vector.shape_cast %1 : vector<8x32xf32> to vector<1x8x32xf32>
    %3 = vector.shape_cast %2 : vector<1x8x32xf32> to vector<1x8x32xf32>
    %4 = vector.broadcast %3 : vector<1x8x32xf32> to vector<4x8x32xf32>
    %c0_2 = arith.constant 0 : index
    %c0_3 = arith.constant 0 : index
    %c0_4 = arith.constant 0 : index
    %5 = vector.load %arg4[%c0_2, %c0_3, %c0_4] : memref<4x32x8xf32, #tpu.memory_space<vmem>>, vector<4x32x8xf32>
    "tpu.trace_start"() <{level = 10 : i32, message = "hse,hed->hsd"}> : () -> ()
    %cst = arith.constant dense<0.000000e+00> : vector<4x8x8xf32>
    %6 = tpu.matmul %4, %5, %cst {dimension_numbers = #tpu.dot_dimension_numbers<[2], [1], [1], [2], [0, 0, 0, 1, 1, 2], [0], [0]>} : vector<4x8x32xf32>, vector<4x32x8xf32>, vector<4x8x8xf32> -> vector<4x8x8xf32>
    "tpu.trace_stop"() : () -> ()
    %c0_5 = arith.constant 0 : index
    %c0_6 = arith.constant 0 : index
    %c0_7 = arith.constant 0 : index
    %7 = vector.load %arg5[%c0_5, %c0_6, %c0_7] : memref<4x1x8xf32, #tpu.memory_space<vmem>>, vector<4x1x8xf32>
    %8 = vector.broadcast %7 : vector<4x1x8xf32> to vector<4x8x8xf32>
    %9 = arith.addf %6, %8 : vector<4x8x8xf32>
    %c0_8 = arith.constant 0 : index
    %c0_9 = arith.constant 0 : index
    %c0_10 = arith.constant 0 : index
    %10 = vector.load %arg2[%c0_8, %c0_9, %c0_10] : memref<1x8x32xf32, #tpu.memory_space<vmem>>, vector<1x8x32xf32>
    %11 = vector.shape_cast %10 : vector<1x8x32xf32> to vector<8x32xf32>
    %12 = vector.shape_cast %11 : vector<8x32xf32> to vector<1x8x32xf32>
    %13 = vector.shape_cast %12 : vector<1x8x32xf32> to vector<1x8x32xf32>
    %14 = vector.broadcast %13 : vector<1x8x32xf32> to vector<4x8x32xf32>
    %c0_11 = arith.constant 0 : index
    %c0_12 = arith.constant 0 : index
    %c0_13 = arith.constant 0 : index
    %15 = vector.load %arg6[%c0_11, %c0_12, %c0_13] : memref<4x32x8xf32, #tpu.memory_space<vmem>>, vector<4x32x8xf32>
    "tpu.trace_start"() <{level = 10 : i32, message = "hse,hed->hsd"}> : () -> ()
    %cst_14 = arith.constant dense<0.000000e+00> : vector<4x8x8xf32>
    %16 = tpu.matmul %14, %15, %cst_14 {dimension_numbers = #tpu.dot_dimension_numbers<[2], [1], [1], [2], [0, 0, 0, 1, 1, 2], [0], [0]>} : vector<4x8x32xf32>, vector<4x32x8xf32>, vector<4x8x8xf32> -> vector<4x8x8xf32>
    "tpu.trace_stop"() : () -> ()
    %c0_15 = arith.constant 0 : index
    %c0_16 = arith.constant 0 : index
    %c0_17 = arith.constant 0 : index
    %17 = vector.load %arg7[%c0_15, %c0_16, %c0_17] : memref<4x1x8xf32, #tpu.memory_space<vmem>>, vector<4x1x8xf32>
    %18 = vector.broadcast %17 : vector<4x1x8xf32> to vector<4x8x8xf32>
    %19 = arith.addf %16, %18 : vector<4x8x8xf32>
    %c0_18 = arith.constant 0 : index
    %c0_19 = arith.constant 0 : index
    %c0_20 = arith.constant 0 : index
    %20 = vector.load %arg3[%c0_18, %c0_19, %c0_20] : memref<1x8x32xf32, #tpu.memory_space<vmem>>, vector<1x8x32xf32>
    %21 = vector.shape_cast %20 : vector<1x8x32xf32> to vector<8x32xf32>
    %22 = vector.shape_cast %21 : vector<8x32xf32> to vector<1x8x32xf32>
    %23 = vector.shape_cast %22 : vector<1x8x32xf32> to vector<1x8x32xf32>
    %24 = vector.broadcast %23 : vector<1x8x32xf32> to vector<4x8x32xf32>
    %c0_21 = arith.constant 0 : index
    %c0_22 = arith.constant 0 : index
    %c0_23 = arith.constant 0 : index
    %25 = vector.load %arg8[%c0_21, %c0_22, %c0_23] : memref<4x32x8xf32, #tpu.memory_space<vmem>>, vector<4x32x8xf32>
    "tpu.trace_start"() <{level = 10 : i32, message = "hse,hed->hsd"}> : () -> ()
    %cst_24 = arith.constant dense<0.000000e+00> : vector<4x8x8xf32>
    %26 = tpu.matmul %24, %25, %cst_24 {dimension_numbers = #tpu.dot_dimension_numbers<[2], [1], [1], [2], [0, 0, 0, 1, 1, 2], [0], [0]>} : vector<4x8x32xf32>, vector<4x32x8xf32>, vector<4x8x8xf32> -> vector<4x8x8xf32>
    "tpu.trace_stop"() : () -> ()
    %c0_25 = arith.constant 0 : index
    %c0_26 = arith.constant 0 : index
    %c0_27 = arith.constant 0 : index
    %27 = vector.load %arg9[%c0_25, %c0_26, %c0_27] : memref<4x1x8xf32, #tpu.memory_space<vmem>>, vector<4x1x8xf32>
    %28 = vector.broadcast %27 : vector<4x1x8xf32> to vector<4x8x8xf32>
    %29 = arith.addf %26, %28 : vector<4x8x8xf32>
    "tpu.trace_start"() <{level = 10 : i32, message = "hqd,hkd->hqk"}> : () -> ()
    %cst_28 = arith.constant dense<0.000000e+00> : vector<4x8x8xf32>
    %30 = tpu.matmul %9, %19, %cst_28 {dimension_numbers = #tpu.dot_dimension_numbers<[2], [2], [1], [1], [0, 0, 0, 1, 1, 1], [0], [0]>} : vector<4x8x8xf32>, vector<4x8x8xf32>, vector<4x8x8xf32> -> vector<4x8x8xf32>
    "tpu.trace_stop"() : () -> ()
    %cst_29 = arith.constant dense<0xFF800000> : vector<4x8xf32>
    %31 = vector.multi_reduction <maximumf>, %30, %cst_29 [2] : vector<4x8x8xf32> to vector<4x8xf32>
    %32 = vector.shape_cast %31 : vector<4x8xf32> to vector<4x8x1xf32>
    %33 = vector.broadcast %32 : vector<4x8x1xf32> to vector<4x8x8xf32>
    %34 = arith.subf %30, %33 : vector<4x8x8xf32>
    %35 = math.exp %34 : vector<4x8x8xf32>
    %cst_30 = arith.constant dense<0.000000e+00> : vector<4x8xf32>
    %36 = vector.multi_reduction <add>, %35, %cst_30 [2] : vector<4x8x8xf32> to vector<4x8xf32>
    %37 = vector.shape_cast %36 : vector<4x8xf32> to vector<4x8x1xf32>
    %38 = tpu.reciprocal %37 : vector<4x8x1xf32> -> vector<4x8x1xf32>
    %39 = vector.broadcast %38 : vector<4x8x1xf32> to vector<4x8x8xf32>
    %40 = arith.mulf %35, %39 : vector<4x8x8xf32>
    "tpu.trace_start"() <{level = 10 : i32, message = "hqk,hkd->hqd"}> : () -> ()
    %cst_31 = arith.constant dense<0.000000e+00> : vector<4x8x8xf32>
    %41 = tpu.matmul %40, %29, %cst_31 {dimension_numbers = #tpu.dot_dimension_numbers<[2], [1], [1], [2], [0, 0, 0, 1, 1, 2], [0], [0]>} : vector<4x8x8xf32>, vector<4x8x8xf32>, vector<4x8x8xf32> -> vector<4x8x8xf32>
    "tpu.trace_stop"() : () -> ()
    %c0_32 = arith.constant 0 : index
    %c0_33 = arith.constant 0 : index
    %c0_34 = arith.constant 0 : index
    %42 = vector.load %arg10[%c0_32, %c0_33, %c0_34] : memref<4x8x32xf32, #tpu.memory_space<vmem>>, vector<4x8x32xf32>
    "tpu.trace_start"() <{level = 10 : i32, message = "hsd,hde->hse"}> : () -> ()
    %cst_35 = arith.constant dense<0.000000e+00> : vector<4x8x32xf32>
    %43 = tpu.matmul %41, %42, %cst_35 {dimension_numbers = #tpu.dot_dimension_numbers<[2], [1], [1], [2], [0, 0, 0, 1, 1, 2], [0], [0]>} : vector<4x8x8xf32>, vector<4x8x32xf32>, vector<4x8x32xf32> -> vector<4x8x32xf32>
    "tpu.trace_stop"() : () -> ()
    %cst_36 = arith.constant dense<0.000000e+00> : vector<8x32xf32>
    %44 = vector.multi_reduction <add>, %43, %cst_36 [0] : vector<4x8x32xf32> to vector<8x32xf32>
    %c0_37 = arith.constant 0 : index
    %c0_38 = arith.constant 0 : index
    %45 = vector.load %arg11[%c0_37, %c0_38] : memref<1x32xf32, #tpu.memory_space<vmem>>, vector<1x32xf32>
    %46 = vector.broadcast %45 : vector<1x32xf32> to vector<8x32xf32>
    %47 = arith.addf %44, %46 : vector<8x32xf32>
    %c0_39 = arith.constant 0 : index
    %c0_40 = arith.constant 0 : index
    %c0_41 = arith.constant 0 : index
    %48 = vector.load %arg12[%c0_39, %c0_40, %c0_41] : memref<1x8x32xf32, #tpu.memory_space<vmem>>, vector<1x8x32xf32>
    %49 = vector.shape_cast %48 : vector<1x8x32xf32> to vector<8x32xf32>
    %50 = vector.shape_cast %47 : vector<8x32xf32> to vector<1x8x32xf32>
    tpu.vector_store %arg12[%c0_39, %c0_40, %c0_41], %50 {strides = array<i32>} : memref<1x8x32xf32, #tpu.memory_space<vmem>>, vector<1x8x32xf32>,
    return
  }
  func.func @transform_0(%arg0: i32) -> (i32, i32, i32) {
    %c0_i32 = arith.constant 0 : i32
    %c0_i32_0 = arith.constant 0 : i32
    %c0_i32_1 = arith.constant 0 : i32
    return %arg0, %c0_i32, %c0_i32_0 : i32, i32, i32
  }
  func.func @transform_1(%arg0: i32) -> (i32, i32, i32) {
    %c0_i32 = arith.constant 0 : i32
    %c0_i32_0 = arith.constant 0 : i32
    %c0_i32_1 = arith.constant 0 : i32
    return %arg0, %c0_i32, %c0_i32_0 : i32, i32, i32
  }
  func.func @transform_2(%arg0: i32) -> (i32, i32, i32) {
    %c0_i32 = arith.constant 0 : i32
    %c0_i32_0 = arith.constant 0 : i32
    %c0_i32_1 = arith.constant 0 : i32
    return %arg0, %c0_i32, %c0_i32_0 : i32, i32, i32
  }
  func.func @transform_3(%arg0: i32) -> (i32, i32, i32) {
    %c0_i32 = arith.constant 0 : i32
    %c0_i32_0 = arith.constant 0 : i32
    %c0_i32_1 = arith.constant 0 : i32
    %c0_i32_2 = arith.constant 0 : i32
    return %c0_i32, %c0_i32_0, %c0_i32_1 : i32, i32, i32
  }
  func.func @transform_4(%arg0: i32) -> (i32, i32, i32) {
    %c0_i32 = arith.constant 0 : i32
    %c0_i32_0 = arith.constant 0 : i32
    %c0_i32_1 = arith.constant 0 : i32
    %c0_i32_2 = arith.constant 0 : i32
    return %c0_i32, %c0_i32_0, %c0_i32_1 : i32, i32, i32
  }
  func.func @transform_5(%arg0: i32) -> (i32, i32, i32) {
    %c0_i32 = arith.constant 0 : i32
    %c0_i32_0 = arith.constant 0 : i32
    %c0_i32_1 = arith.constant 0 : i32
    %c0_i32_2 = arith.constant 0 : i32
    return %c0_i32, %c0_i32_0, %c0_i32_1 : i32, i32, i32
  }
  func.func @transform_6(%arg0: i32) -> (i32, i32, i32) {
    %c0_i32 = arith.constant 0 : i32
    %c0_i32_0 = arith.constant 0 : i32
    %c0_i32_1 = arith.constant 0 : i32
    %c0_i32_2 = arith.constant 0 : i32
    return %c0_i32, %c0_i32_0, %c0_i32_1 : i32, i32, i32
  }
  func.func @transform_7(%arg0: i32) -> (i32, i32, i32) {
    %c0_i32 = arith.constant 0 : i32
    %c0_i32_0 = arith.constant 0 : i32
    %c0_i32_1 = arith.constant 0 : i32
    %c0_i32_2 = arith.constant 0 : i32
    return %c0_i32, %c0_i32_0, %c0_i32_1 : i32, i32, i32
  }
  func.func @transform_8(%arg0: i32) -> (i32, i32, i32) {
    %c0_i32 = arith.constant 0 : i32
    %c0_i32_0 = arith.constant 0 : i32
    %c0_i32_1 = arith.constant 0 : i32
    %c0_i32_2 = arith.constant 0 : i32
    return %c0_i32, %c0_i32_0, %c0_i32_1 : i32, i32, i32
  }
  func.func @transform_9(%arg0: i32) -> (i32, i32, i32) {
    %c0_i32 = arith.constant 0 : i32
    %c0_i32_0 = arith.constant 0 : i32
    %c0_i32_1 = arith.constant 0 : i32
    %c0_i32_2 = arith.constant 0 : i32
    return %c0_i32, %c0_i32_0, %c0_i32_1 : i32, i32, i32
  }
  func.func @transform_10(%arg0: i32) -> (i32, i32) {
    %c0_i32 = arith.constant 0 : i32
    %c0_i32_0 = arith.constant 0 : i32
    %c0_i32_1 = arith.constant 0 : i32
    return %c0_i32, %c0_i32_0 : i32, i32
  }
  func.func @transform_11(%arg0: i32) -> (i32, i32, i32) {
    %c0_i32 = arith.constant 0 : i32
    %c0_i32_0 = arith.constant 0 : i32
    %c0_i32_1 = arith.constant 0 : i32
    return %arg0, %c0_i32, %c0_i32_0 : i32, i32, i32
  }
}

</mosaic_0001>

<bundles_post_ra>
// kernel: tpu_custom_call.1
= control target key start
LH: loop header
LB: loop body
LE: loop exit
PB: predicated region body
PF: predicated region fallthrough
CT: control target
= control target key end

     0   :  { %s3472_s0 = inlined_call_operand.vmem [shape: f32[2,8,32], index: 0, kind: input, shape index: {}]   ;;  %s3473_s1 = inlined_call_operand.vmem [shape: f32[2,8,32], index: 1, kind: input, shape index: {}]   ;;  %s3474_s2 = inlined_call_operand.vmem [shape: f32[2,8,32], index: 2, kind: input, shape index: {}]   ;;  %s3475_s3 = inlined_call_operand.vmem [shape: f32[4,32,8], index: 3, kind: input, shape index: {}]   ;;  %s3476_s4 = inlined_call_operand.vmem [shape: f32[4,1,8], index: 4, kind: input, shape index: {}]   ;;  %s3477_s5 = inlined_call_operand.vmem [shape: f32[4,32,8], index: 5, kind: input, shape index: {}]   ;;  %s3478_s6 = inlined_call_operand.vmem [shape: f32[4,1,8], index: 6, kind: input, shape index: {}]   ;;  %s3479_s7 = inlined_call_operand.vmem [shape: f32[4,32,8], index: 7, kind: input, shape index: {}]   ;;  %s3480_s8 = inlined_call_operand.vmem [shape: f32[4,1,8], index: 8, kind: input, shape index: {}]   ;;  %s3481_s9 = inlined_call_operand.vmem [shape: f32[4,8,32], index: 9, kind: input, shape index: {}]   ;;  %s3482_s10 = inlined_call_operand.vmem [shape: f32[1,32], index: 10, kind: input, shape index: {}]   ;;  %s3483_s11 = inlined_call_operand.hbm [shape: f32[2,8,32], index: 11, kind: output, shape index: {}]  }
   0x1   :  { %3484 = sst [smem:[#allocation6_spill]] %s3472_s0 }
   0x2   :  { %16 = vsyncpa [#allocation3], 0 }
   0x3   :  { %18 = vsyncpa [#allocation3 + $0x1], 0  ;;  %s3038_s17 = smov 0   ;;  %s3040_s18 = smov 0  }
   0x4   :  { %s3042_s19 = smov 0   ;;  %s3044_s20 = smov 0  }
   0x5 LB: > { %s3059_s21 = sadd.s32 4294967295, %s2972_s20   ;;  %s2451_s22 = sadd.s32 4294967294, %s2972_s20   ;;  %s2972_s20 = sphi %s3044_s20, %s3493_s20   ;;  %s2968_s19 = sphi %s3042_s19, %s3492_s19   ;;  %s2964_s18 = sphi %s3040_s18, %s3491_s18   ;;  %s2960_s17 = sphi %s3038_s17, %s3490_s17  }
   0x6   : > { %s3063_s23 = sadd.s32 1, %s2972_s20   ;;  %s277_s24 = sadd.s32 1, %s2968_s19 }
   0x7   : > { %s274_s25 = ssub.s32 %s2972_s20, %s3063_s23  ;;  %p287_p0 = scmp.ne.s32.totalorder %s2968_s19, %s2964_s18 }
   0x8   : > { %p275_p1 = scmp.eq.s32.totalorder %s274_s25, 0  ;;  %p288_p2 = scmp.eq.s32.totalorder %s3059_s21, 1 }
   0x9   : > { %p293_p3 = scmp.ne.s32.totalorder %s2964_s18, %s2960_s17  ;;  %p294_p4 = scmp.eq.s32.totalorder %s2451_s22, 1 }
   0xa   : > { %s3074_s26 = scalar_select %p275_p1, %s2968_s19, %s277_s24  }
   0xb   : > { %p3076_p5 = por %p288_p2, %p287_p0  ;;  %p3080_p6 = por %p294_p4, %p293_p3 }
   0xc   : > { %3485 = sst [smem:[#allocation5_spill]] %s3074_s26  ;;  %p2454_p7 = scmp.ge.s32.totalorder %s2972_s20, 1 }
   0xd   : > { %p357_p8 = scmp.lt.s32.totalorder %s2972_s20, 3 }
   0xf   : > { %p358_p9 = pnand %p2454_p7, %p357_p8 }
  0x10   : > { %v417_v0 = vld [vmem:[%s3475_s3] sm:$0xff] (!%p358_p9)  ;;  %v418_v1 = vld [vmem:[%s3475_s3 + $0x8] sm:$0xff] (!%p358_p9)  ;;  %v2974_v3 = vmov (!%p358_p9), 0.0|0.0   ;;  %v419_v6 = vld [vmem:[%s3475_s3 + $0x10] sm:$0xff] (!%p358_p9)  ;;  %p404_p10 = scmp.lt.s32.totalorder (!%p358_p9), %s3059_s21, 1  ;;  %vm2975_vm0 = vmmov (!%p358_p9), 0  }
  0x11   : > { %361 = sbr.rel (%p358_p9) target bundleno = 1243 (0x4db), region = 64  ;;  %v421_v2 = vld [vmem:[%s3475_s3 + $0x20] sm:$0xff] (!%p358_p9)  ;;  %2780 = vmatprep.subr.bf16.mxu0 (!%p358_p9), %v2974_v3  ;;  %2786 = vmatprep.subr.bf16.mxu1 (!%p358_p9), %v2974_v3  ;;  %v2781_v4 = vpack.c.bf16 (!%p358_p9), %v418_v1, %v417_v0  ;;  %v422_v5 = vld [vmem:[%s3475_s3 + $0x28] sm:$0xff] (!%p358_p9)  ;;  %v420_v7 = vld [vmem:[%s3475_s3 + $0x18] sm:$0xff] (!%p358_p9)  ;;  %v2976_v11 = vmov (!%p358_p9), 0.0   ;;  %s3488_s0 = sld [smem:[#allocation6_spill]] (!%p358_p9) }
  0x12   : > { %v2787_v8 = vpack.c.bf16 (!%p358_p9), %v422_v5, %v421_v2  ;;  %v423_v9 = vld [vmem:[%s3475_s3 + $0x30] sm:$0xff] (!%p358_p9)  ;;  %v424_v10 = vld [vmem:[%s3475_s3 + $0x38] sm:$0xff] (!%p358_p9)  ;;  %2596 = vmatprep.mubr.msk.f32.mxu0 (!%p358_p9), %vm2975_vm0, %v2976_v11  ;;  %2607 = vmatprep.mubr.msk.f32.mxu1 (!%p358_p9), %vm2975_vm0, %v2976_v11  ;;  %v2784_v12 = vpack.c.bf16 (!%p358_p9), %v420_v7, %v419_v6  ;;  %v425_v14 = vld [vmem:[%s3475_s3 + $0x40] sm:$0xff] (!%p358_p9)  ;;  %vm461_vm1 = vcmask (!%p358_p9), 261120   ;;  %vm1401_vm2 = vcmask (!%p358_p9), 64512   ;;  %s2501_s13 = sshll.u32 (!%p358_p9), %s3059_s21, 7 }
  0x13   : > { %2782 = vmatpush3.bf16.msra.mxu0 (!%p358_p9), %v2781_v4  ;;  %v2790_v13 = vpack.c.bf16 (!%p358_p9), %v424_v10, %v423_v9  ;;  %v426_v15 = vld [vmem:[%s3475_s3 + $0x48] sm:$0xff] (!%p358_p9)  ;;  %v429_v16 = vld [vmem:[%s3475_s3 + $0x60] sm:$0xff] (!%p358_p9)  ;;  %v427_v21 = vld [vmem:[%s3475_s3 + $0x50] sm:$0xff] (!%p358_p9) }
  0x14   : > { %2788 = vmatpush3.bf16.msra.mxu1 (!%p358_p9), %v2787_v8  ;;  %2783 = vmatprep.subr.bf16.mxu0 (!%p358_p9), %v2974_v3  ;;  %v430_v17 = vld [vmem:[%s3475_s3 + $0x68] sm:$0xff] (!%p358_p9)  ;;  %v2793_v19 = vpack.c.bf16 (!%p358_p9), %v426_v15, %v425_v14  ;;  %v428_v22 = vld [vmem:[%s3475_s3 + $0x58] sm:$0xff] (!%p358_p9)  ;;  %v431_v23 = vld [vmem:[%s3475_s3 + $0x70] sm:$0xff] (!%p358_p9) }
  0x15   : > { %2789 = vmatprep.subr.bf16.mxu1 (!%p358_p9), %v2974_v3  ;;  %v2799_v20 = vpack.c.bf16 (!%p358_p9), %v430_v17, %v429_v16  ;;  %v432_v24 = vld [vmem:[%s3475_s3 + $0x78] sm:$0xff] (!%p358_p9)  ;;  %v2796_v25 = vpack.c.bf16 (!%p358_p9), %v428_v22, %v427_v21  ;;  %v746_v27 = vld [vmem:[%s3477_s5] sm:$0xff] (!%p358_p9)  ;;  %v747_v28 = vld [vmem:[%s3477_s5 + $0x8] sm:$0xff] (!%p358_p9) }
  0x16   : > { %v2802_v26 = vpack.c.bf16 (!%p358_p9), %v432_v24, %v431_v23  ;;  %v750_v29 = vld [vmem:[%s3477_s5 + $0x20] sm:$0xff] (!%p358_p9)  ;;  %v751_v30 = vld [vmem:[%s3477_s5 + $0x28] sm:$0xff] (!%p358_p9)  ;;  %v2805_v31 = vpack.c.bf16 (!%p358_p9), %v747_v28, %v746_v27  ;;  %v748_v33 = vld [vmem:[%s3477_s5 + $0x10] sm:$0xff] (!%p358_p9) }
  0x17   : > { %2785 = vmatpush3.bf16.msra.mxu0 (!%p358_p9), %v2784_v12  ;;  %v2811_v32 = vpack.c.bf16 (!%p358_p9), %v751_v30, %v750_v29  ;;  %v749_v34 = vld [vmem:[%s3477_s5 + $0x18] sm:$0xff] (!%p358_p9)  ;;  %v752_v35 = vld [vmem:[%s3477_s5 + $0x30] sm:$0xff] (!%p358_p9)  ;;  %v754_v39 = vld [vmem:[%s3477_s5 + $0x40] sm:$0xff] (!%p358_p9) }
  0x18   : > { %s405_s16 = scalar_select %p404_p10, %s3059_s21, 1  ;;  %2791 = vmatpush3.bf16.msra.mxu1 %v2790_v13  ;;  %2792 = vmatprep.subr.bf16.mxu0 %v2974_v3  ;;  %v753_v36 = vld [vmem:[%s3477_s5 + $0x38] sm:$0xff]  ;;  %v2808_v37 = vpack.c.bf16 %v749_v34, %v748_v33  ;;  %v755_v40 = vld [vmem:[%s3477_s5 + $0x48] sm:$0xff]  ;;  %v758_v41 = vld [vmem:[%s3477_s5 + $0x60] sm:$0xff] }
  0x19   : > { %2798 = vmatprep.subr.bf16.mxu1 %v2974_v3  ;;  %v2814_v38 = vpack.c.bf16 %v753_v36, %v752_v35  ;;  %v759_v42 = vld [vmem:[%s3477_s5 + $0x68] sm:$0xff]  ;;  %v2817_v44 = vpack.c.bf16 %v755_v40, %v754_v39  ;;  %v756_v46 = vld [vmem:[%s3477_s5 + $0x50] sm:$0xff]  ;;  %v757_v47 = vld [vmem:[%s3477_s5 + $0x58] sm:$0xff]  ;;  %s2977_s21 = smov [#allocation2]  }
  0x1a   : > { %s3126_s30 = sshll.u32 %s405_s16, 3  ;;  %v2823_v45 = vpack.c.bf16 %v759_v42, %v758_v41  ;;  %v760_v48 = vld [vmem:[%s3477_s5 + $0x70] sm:$0xff]  ;;  %v761_v49 = vld [vmem:[%s3477_s5 + $0x78] sm:$0xff]  ;;  %v2820_v50 = vpack.c.bf16 %v757_v47, %v756_v46  ;;  %v1074_v52 = vld [vmem:[%s3479_s7] sm:$0xff] }
  0x1b   : > { %s407_s24 = scalar_lea.vmem %s3488_s0, %s3126_s30  ;;  %s411_s14 = scalar_lea.vmem %s3473_s1, %s3126_s30  ;;  %v2826_v51 = vpack.c.bf16 %v761_v49, %v760_v48  ;;  %v1075_v53 = vld [vmem:[%s3479_s7 + $0x8] sm:$0xff]  ;;  %v1078_v54 = vld [vmem:[%s3479_s7 + $0x20] sm:$0xff]  ;;  %v1076_v58 = vld [vmem:[%s3479_s7 + $0x10] sm:$0xff] }
  0x1c   : > { %v416_v18 = vld [vmem:[%s407_s24] sm:$0xff]  ;;  %v1079_v55 = vld [vmem:[%s3479_s7 + $0x28] sm:$0xff]  ;;  %v2829_v56 = vpack.c.bf16 %v1075_v53, %v1074_v52  ;;  %v1077_v59 = vld [vmem:[%s3479_s7 + $0x18] sm:$0xff]  ;;  %s415_s0 = scalar_lea.vmem %s3474_s2, %s3126_s30  ;;  %s3429_s30 = scalar_lea.hbm %s3483_s11, %s2501_s13 }
  0x1d   : > { %2597 = vmatmul.mubr.msk.f32.vlgmr.msra.gmra.mrb[0].mxu0 %vm461_vm1, %v416_v18  ;;  %2608 = vmatmul.mubr.msk.f32.vlgmr.msra.gmra.mrb[0].mxu1 %vm461_vm1, %v416_v18  ;;  %v745_v43 = vld [vmem:[%s411_s14] sm:$0xff]  ;;  %v2835_v57 = vpack.c.bf16 %v1079_v55, %v1078_v54  ;;  %v1080_v60 = vld [vmem:[%s3479_s7 + $0x30] sm:$0xff]  ;;  %v2832_v61 = vpack.c.bf16 %v1077_v59, %v1076_v58  ;;  %v1081_v62 = vld [vmem:[%s3479_s7 + $0x38] sm:$0xff]  ;;  %s401_s14 = sand.u32 1, %s2964_s18  }
  0x1e   : > { %2794 = vmatpush3.bf16.msra.mxu0 %v2793_v19  ;;  %2800 = vmatpush3.bf16.msra.mxu1 %v2799_v20  ;;  %v2838_v63 = vpack.c.bf16 %v1081_v62, %v1080_v60  ;;  %v1082_v0 = vld [vmem:[%s3479_s7 + $0x40] sm:$0xff]  ;;  %v1083_v1 = vld [vmem:[%s3479_s7 + $0x48] sm:$0xff]  ;;  %v1084_v8 = vld [vmem:[%s3479_s7 + $0x50] sm:$0xff]  ;;  %s2455_s29 = sshll.u32 %s401_s14, 3  ;;  %s2355_s16 = scalar_lea.sflag [#allocation3], %s401_s14 }
  0x1f   : > { %2795 = vmatprep.subr.bf16.mxu0 %v2974_v3  ;;  %2801 = vmatprep.subr.bf16.mxu1 %v2974_v3  ;;  %v1086_v2 = vld [vmem:[%s3479_s7 + $0x60] sm:$0xff]  ;;  %v2841_v5 = vpack.c.bf16 %v1083_v1, %v1082_v0  ;;  %v1087_v6 = vld [vmem:[%s3479_s7 + $0x68] sm:$0xff]  ;;  %v1085_v9 = vld [vmem:[%s3479_s7 + $0x58] sm:$0xff]  ;;  %s403_s15 = scalar_lea.vmem [#allocation2], %s2455_s29  ;;  %s2914_s29 = sshll.u32 %s2977_s21, 4  ;;  %s2915_s29 = int_to_ptr.vmem [resolvable:$false] %s2914_s29 }
  0x20   : > { %2618 = vmatprep.mubr.msk.f32.mxu0 %vm2975_vm0, %v2976_v11  ;;  %2629 = vmatprep.mubr.msk.f32.mxu1 %vm2975_vm0, %v2976_v11  ;;  %v1073_v4 = vld [vmem:[%s415_s0] sm:$0xff]  ;;  %v2847_v7 = vpack.c.bf16 %v1087_v6, %v1086_v2  ;;  %v1088_v10 = vld [vmem:[%s3479_s7 + $0x70] sm:$0xff]  ;;  %v2844_v12 = vpack.c.bf16 %v1085_v9, %v1084_v8  ;;  %v1089_v13 = vld [vmem:[%s3479_s7 + $0x78] sm:$0xff]  ;;  %s2368_s22 = sshll.u32 %s403_s15, 4  ;;  %s2916_s12 = scalar_lea.vmem %s2915_s29, 256  ;;  %s3431_s22 = int_to_ptr.vmem [resolvable:$true] %s2368_s22 }
  0x21   : > { %v2850_v14 = vpack.c.bf16 %v1089_v13, %v1088_v10  ;;  %v2467_v22 = vld [vmem:[%s3478_s6] ss:$0 sm:$0xff]  ;;  %v2468_v23 = vld [vmem:[%s3478_s6 + $0x1] ss:$0 sm:$0xff]  ;;  %v2469_v34 = vld [vmem:[%s3478_s6 + $0x2] ss:$0 sm:$0xff]  ;;  %p2917_p0 = scmp.lt.s32.totalorder %s3431_s22, %s2915_s29 }
  0x22   : > { %2797 = vmatpush3.bf16.msra.mxu0 %v2796_v25  ;;  %2803 = vmatpush3.bf16.msra.mxu1 %v2802_v26  ;;  %v2459_v25 = vld [vmem:[%s3476_s4] ss:$0 sm:$0xff]  ;;  %v2460_v29 = vld [vmem:[%s3476_s4 + $0x1] ss:$0 sm:$0xff]  ;;  %v2470_v35 = vld [vmem:[%s3478_s6 + $0x3] ss:$0 sm:$0xff] }
  0x23   : > { %2804 = vmatprep.subr.bf16.mxu0 %v2974_v3  ;;  %2810 = vmatprep.subr.bf16.mxu1 %v2974_v3  ;;  %v2462_v41 = vld [vmem:[%s3476_s4 + $0x3] ss:$0 sm:$0xff]  ;;  %v2475_v46 = vld [vmem:[%s3480_s8] ss:$0 sm:$0xff]  ;;  %v2476_v47 = vld [vmem:[%s3480_s8 + $0x1] ss:$0 sm:$0xff] }
  0x24   : > { %s2910_s25 = scalar_lea.vmem %s3431_s22, 128 }
  0x25   : > { %2619 = vmatmul.mubr.msk.f32.vlgmr.msra.gmra.mrb[2].mxu0 %vm461_vm1, %v416_v18  ;;  %2630 = vmatmul.mubr.msk.f32.vlgmr.msra.gmra.mrb[2].mxu1 %vm461_vm1, %v416_v18  ;;  %p2911_p11 = scmp.ne.s32.totalorder %s3431_s22, %s2910_s25  ;;  %p2918_p1 = scmp.lt.s32.totalorder %s2916_s12, %s2910_s25 }
  0x26   : > { %2806 = vmatpush3.bf16.msra.mxu0 %v2805_v31  ;;  %2812 = vmatpush3.bf16.msra.mxu1 %v2811_v32 }
  0x27   : > { %2807 = vmatprep.subr.bf16.mxu0 %v2974_v3  ;;  %2813 = vmatprep.subr.bf16.mxu1 %v2974_v3  ;;  %p2912_p12 = pnand %p2911_p11, %p3076_p5  ;;  %p2919_p2 = por %p2918_p1, %p2917_p0 }
  0x28   : > { %2640 = vmatprep.mubr.msk.f32.mxu0 %vm2975_vm0, %v2976_v11  ;;  %2651 = vmatprep.mubr.msk.f32.mxu1 %vm2975_vm0, %v2976_v11 }
  0x29   : > { %p2913_p13 = pneg %p2912_p12 }
  0x2a   : > { %2809 = vmatpush3.bf16.msra.mxu0 %v2808_v37  ;;  %2815 = vmatpush3.bf16.msra.mxu1 %v2814_v38  ;;  %v2461_v37 = vld [vmem:[%s3476_s4 + $0x2] ss:$0 sm:$0xff] }
  0x2b   : > { %2816 = vmatprep.subr.bf16.mxu0 %v2974_v3  ;;  %2822 = vmatprep.subr.bf16.mxu1 %v2974_v3  ;;  %p2920_p3 = pnand %p2919_p2, %p2913_p13 }
  0x2d   : > { %2641 = vmatmul.mubr.msk.f32.vlgmr.msra.gmra.mrb[4].mxu0 %vm461_vm1, %v745_v43  ;;  %2652 = vmatmul.mubr.msk.f32.vlgmr.msra.gmra.mrb[4].mxu1 %vm461_vm1, %v745_v43 }
  0x2e   : > { %2818 = vmatpush3.bf16.msra.mxu0 %v2817_v44  ;;  %2824 = vmatpush3.bf16.msra.mxu1 %v2823_v45 }
  0x2f   : > { %2819 = vmatprep.subr.bf16.mxu0 %v2974_v3  ;;  %2825 = vmatprep.subr.bf16.mxu1 %v2974_v3 }
  0x30   : > { %2662 = vmatprep.mubr.msk.f32.mxu0 %vm2975_vm0, %v2976_v11  ;;  %2673 = vmatprep.mubr.msk.f32.mxu1 %vm2975_vm0, %v2976_v11 }
  0x32   : > { %2821 = vmatpush3.bf16.msra.mxu0 %v2820_v50  ;;  %2827 = vmatpush3.bf16.msra.mxu1 %v2826_v51 }
  0x33   : > { %2828 = vmatprep.subr.bf16.mxu0 %v2974_v3  ;;  %2834 = vmatprep.subr.bf16.mxu1 %v2974_v3 }
  0x35   : > { %2663 = vmatmul.mubr.msk.f32.vlgmr.msra.gmra.mrb[6].mxu0 %vm461_vm1, %v745_v43  ;;  %2674 = vmatmul.mubr.msk.f32.vlgmr.msra.gmra.mrb[6].mxu1 %vm461_vm1, %v745_v43 }
  0x36   : > { %2830 = vmatpush3.bf16.msra.mxu0 %v2829_v56  ;;  %2836 = vmatpush3.bf16.msra.mxu1 %v2835_v57 }
  0x37   : > { %2831 = vmatprep.subr.bf16.mxu0 %v2974_v3  ;;  %2837 = vmatprep.subr.bf16.mxu1 %v2974_v3 }
  0x38   : > { %2684 = vmatprep.mubr.msk.f32.mxu0 %vm2975_vm0, %v2976_v11  ;;  %2695 = vmatprep.mubr.msk.f32.mxu1 %vm2975_vm0, %v2976_v11 }
  0x3a   : > { %2833 = vmatpush3.bf16.msra.mxu0 %v2832_v61  ;;  %2839 = vmatpush3.bf16.msra.mxu1 %v2838_v63 }
  0x3b   : > { %2840 = vmatprep.subr.bf16.mxu0 %v2974_v3  ;;  %2846 = vmatprep.subr.bf16.mxu1 %v2974_v3 }
  0x3d   : > { %2685 = vmatmul.mubr.msk.f32.vlgmr.msra.gmra.mrb[8].mxu0 %vm461_vm1, %v1073_v4  ;;  %2696 = vmatmul.mubr.msk.f32.vlgmr.msra.gmra.mrb[8].mxu1 %vm461_vm1, %v1073_v4 }
  0x3e   : > { %2842 = vmatpush3.bf16.msra.mxu0 %v2841_v5  ;;  %2848 = vmatpush3.bf16.msra.mxu1 %v2847_v7 }
  0x3f   : > { %2843 = vmatprep.subr.bf16.mxu0 %v2974_v3  ;;  %2849 = vmatprep.subr.bf16.mxu1 %v2974_v3 }
  0x40   : > { %2706 = vmatprep.mubr.msk.f32.mxu0 %vm2975_vm0, %v2976_v11  ;;  %2717 = vmatprep.mubr.msk.f32.mxu1 %vm2975_vm0, %v2976_v11 }
  0x42   : > { %2845 = vmatpush3.bf16.msra.mxu0 %v2844_v12  ;;  %2851 = vmatpush3.bf16.msra.mxu1 %v2850_v14 }
  0x43   : > { %2720 = vmatprep.subr.mxu0 %v2976_v11  ;;  %2725 = vmatprep.subr.mxu1 %v2976_v11 }
  0x45   : > { %2707 = vmatmul.mubr.msk.f32.vlgmr.msra.gmra.mrb[10].mxu0 %vm461_vm1, %v1073_v4  ;;  %2718 = vmatmul.mubr.msk.f32.vlgmr.msra.gmra.mrb[10].mxu1 %vm461_vm1, %v1073_v4 }
  0x46   : > { %2722 = vmatprep.mubr.msk.f32.mxu0 %vm2975_vm0, %v2976_v11  ;;  %2727 = vmatprep.mubr.msk.f32.mxu1 %vm2975_vm0, %v2976_v11 }
  0xf0   : > { %v531_v3 = vpop.f32.mrb[0].mxu0  ;;  %v601_v16 = vpop.f32.mrb[0].mxu1 }
  0xf1   : > { %v2598_v15 = vpop.f32.mrb[1].mxu0  ;;  %v2609_v17 = vpop.f32.mrb[1].mxu1  ;;  %v532_v32 = vadd.f32 %v2459_v25, %v531_v3  ;;  %v602_v33 = vadd.f32 %v2460_v29, %v601_v16 }
  0xf8   : > { %v671_v18 = vpop.f32.mrb[2].mxu0  ;;  %v741_v20 = vpop.f32.mrb[2].mxu1 }
  0xf9   : > { %v2620_v19 = vpop.f32.mrb[3].mxu0  ;;  %v2631_v21 = vpop.f32.mrb[3].mxu1  ;;  %v672_v44 = vadd.f32 %v2461_v37, %v671_v18  ;;  %v742_v45 = vadd.f32 %v2462_v41, %v741_v20 }
 0x100   : > { %v859_v24 = vpop.f32.mrb[4].mxu0  ;;  %v929_v27 = vpop.f32.mrb[4].mxu1 }
 0x101   : > { %v860_v26 = vadd.f32 %v2467_v22, %v859_v24  ;;  %v2642_v28 = vpop.f32.mrb[5].mxu0  ;;  %v930_v30 = vadd.f32 %v2468_v23, %v929_v27  ;;  %v2653_v31 = vpop.f32.mrb[5].mxu1 }
 0x103   : > { %2721 = vmatpush3.xpose.msk.msra.mxu0 %vm1401_vm2, %v860_v26  ;;  %2726 = vmatpush3.xpose.msk.msra.mxu1 %vm1401_vm2, %v930_v30  ;;  %v2477_v30 = vld [vmem:[%s3480_s8 + $0x2] ss:$0 sm:$0xff] }
 0x104   : > { %2730 = vmatprep.subr.mxu0 %v2976_v11  ;;  %2735 = vmatprep.subr.mxu1 %v2976_v11 }
 0x106   : > { %2723 = vmatmul.mubr.msk.f32.vlgmr.msra.gmra.mrb[12].mxu0 %vm1401_vm2, %v532_v32  ;;  %2728 = vmatmul.mubr.msk.f32.vlgmr.msra.gmra.mrb[12].mxu1 %vm1401_vm2, %v602_v33 }
 0x107   : > { %2732 = vmatprep.mubr.msk.f32.mxu0 %vm2975_vm0, %v2976_v11  ;;  %2737 = vmatprep.mubr.msk.f32.mxu1 %vm2975_vm0, %v2976_v11 }
 0x108   : > { %v999_v36 = vpop.f32.mrb[6].mxu0  ;;  %v1069_v39 = vpop.f32.mrb[6].mxu1 }
 0x109   : > { %v1000_v38 = vadd.f32 %v2469_v34, %v999_v36  ;;  %v2664_v40 = vpop.f32.mrb[7].mxu0  ;;  %v1070_v42 = vadd.f32 %v2470_v35, %v1069_v39  ;;  %v2675_v43 = vpop.f32.mrb[7].mxu1  ;;  %v2478_v35 = vld [vmem:[%s3480_s8 + $0x3] ss:$0 sm:$0xff] }
 0x10a   : > { %v2042_v43 = vld [vmem:[%s3481_s9] sm:$0xff] }
 0x10b   : > { %2731 = vmatpush3.xpose.msk.msra.mxu0 %vm1401_vm2, %v1000_v38  ;;  %2736 = vmatpush3.xpose.msk.msra.mxu1 %vm1401_vm2, %v1070_v42 }
 0x10c   : > { %2740 = vmatprep.subr.mxu0 %v2976_v11  ;;  %2745 = vmatprep.subr.mxu1 %v2976_v11 }
 0x10e   : > { %2733 = vmatmul.mubr.msk.f32.vlgmr.msra.gmra.mrb[14].mxu0 %vm1401_vm2, %v672_v44  ;;  %2738 = vmatmul.mubr.msk.f32.vlgmr.msra.gmra.mrb[14].mxu1 %vm1401_vm2, %v742_v45  ;;  %v2043_v44 = vld [vmem:[%s3481_s9 + $0x8] sm:$0xff]  ;;  %v2044_v45 = vld [vmem:[%s3481_s9 + $0x10] sm:$0xff] }
 0x10f   : > { %2742 = vmatprep.mubr.msk.f32.mxu0 %vm2975_vm0, %v2976_v11  ;;  %2747 = vmatprep.mubr.msk.f32.mxu1 %vm2975_vm0, %v2976_v11 }
 0x110   : > { %v1187_v48 = vpop.f32.mrb[8].mxu0  ;;  %v1257_v51 = vpop.f32.mrb[8].mxu1 }
 0x111   : > { %v1188_v49 = vadd.f32 %v2475_v46, %v1187_v48  ;;  %v2686_v50 = vpop.f32.mrb[9].mxu0  ;;  %v1258_v52 = vadd.f32 %v2476_v47, %v1257_v51  ;;  %v2697_v53 = vpop.f32.mrb[9].mxu1  ;;  %v2045_v48 = vld [vmem:[%s3481_s9 + $0x18] sm:$0xff] }
 0x113   : > { %2741 = vmatpush3.msra.mxu0 %v1188_v49  ;;  %2746 = vmatpush3.msra.mxu1 %v1258_v52 }
 0x114   : > { %2750 = vmatprep.subr.mxu0 %v2976_v11  ;;  %2755 = vmatprep.subr.mxu1 %v2976_v11 }
 0x118   : > { %v1327_v54 = vpop.f32.mrb[10].mxu0  ;;  %v3364_v55 = vpop.f32.mrb[10].mxu1 }
 0x119   : > { %v2708_v56 = vpop.f32.mrb[11].mxu0  ;;  %v2719_v57 = vpop.f32.mrb[11].mxu1  ;;  %v1328_v34 = vadd.f32 %v2477_v30, %v1327_v54  ;;  %v1398_v38 = vadd.f32 %v2478_v35, %v3364_v55 }
 0x1d9   : > { %v1474_v58 = vpop.f32.mrb[12].mxu0  ;;  %v1550_v59 = vpop.f32.mrb[12].mxu1 }
 0x1da   : > { %v2724_v60 = vpop.f32.mrb[13].mxu0  ;;  %v1706_v61 = vsel %vm1401_vm2, %v1474_v58, -inf  ;;  %v2729_v62 = vpop.f32.mrb[13].mxu1  ;;  %v1709_v63 = vsel %vm1401_vm2, %v1550_v59, -inf }
 0x1db   : > { %1707 = vmax.xlane.f32.xlu0 %v1706_v61 }
 0x1df   : > { %1710 = vmax.xlane.f32.xlu0 %v1709_v63 }
 0x1e1   : > { %v1626_v0 = vpop.f32.mrb[14].mxu0  ;;  %v1702_v1 = vpop.f32.mrb[14].mxu1 }
 0x1e2   : > { %v2734_v2 = vpop.f32.mrb[15].mxu0  ;;  %v1712_v4 = vsel %vm1401_vm2, %v1626_v0, -inf  ;;  %v2739_v5 = vpop.f32.mrb[15].mxu1  ;;  %v1715_v6 = vsel %vm1401_vm2, %v1702_v1, -inf }
 0x1e3   : > { %1713 = vmax.xlane.f32.xlu1 %v1712_v4  ;;  %v2499_v4 = vld [vmem:[%s3482_s10] ss:$0 sm:$0xff] }
 0x1e7   : > { %1716 = vmax.xlane.f32.xlu1 %v1715_v6 }
 0x268   : > { %v1708_v7 = vpop.xlane.xlu0 %1707 }
 0x269   : > { %v1718_v8 = vsub.f32 %v1474_v58, %v1708_v7 }
 0x26b   : > { %v1722_v9 = vmul.f32 1.442695, %v1718_v8 }
 0x26c   : > { %v1711_v10 = vpop.xlane.xlu0 %1710 }
 0x26d   : > { %2894 = vpow2.f32 %v1722_v9  ;;  %v1719_v12 = vsub.f32 %v1550_v59, %v1711_v10 }
 0x26f   : > { %v1724_v13 = vmul.f32 1.442695, %v1719_v12 }
 0x270   : > { %v1714_v14 = vpop.xlane.xlu1 %1713 }
 0x271   : > { %2896 = vpow2.f32 %v1724_v13  ;;  %v1720_v3 = vsub.f32 %v1626_v0, %v1714_v14 }
 0x273   : > { %v1726_v15 = vmul.f32 1.442695, %v1720_v3 }
 0x274   : > { %v1717_v16 = vpop.xlane.xlu1 %1716 }
 0x275   : > { %2898 = vpow2.f32 %v1726_v15  ;;  %v1721_v17 = vsub.f32 %v1702_v1, %v1717_v16 }
 0x277   : > { %v2895_v18 = vpop.eup %2894  ;;  %v1728_v19 = vmul.f32 1.442695, %v1721_v17 }
 0x278   : > { %v1730_v20 = vsel %vm1401_vm2, %v2895_v18, 0.0 }
 0x279   : > { %2900 = vpow2.f32 %v1728_v19  ;;  %1731 = vadd.xlane.f32.xlu0 %v1730_v20 }
 0x27b   : > { %v2897_v21 = vpop.eup %2896 }
 0x27c   : > { %v1733_v22 = vsel %vm1401_vm2, %v2897_v21, 0.0 }
 0x27d   : > { %1734 = vadd.xlane.f32.xlu1 %v1733_v22 }
 0x27f   : > { %v2899_v23 = vpop.eup %2898 }
 0x280   : > { %v1736_v24 = vsel %vm1401_vm2, %v2899_v23, 0.0 }
 0x281   : > { %1737 = vadd.xlane.f32.xlu0 %v1736_v24 }
 0x283   : > { %v2901_v25 = vpop.eup %2900 }
 0x284   : > { %v1739_v26 = vsel %vm1401_vm2, %v2901_v25, 0.0 }
 0x285   : > { %1740 = vadd.xlane.f32.xlu1 %v1739_v26 }
 0x306   : > { %v1732_v27 = vpop.xlane.xlu0 %1731 }
 0x307   : > { %2902 = vrcp.f32 %v1732_v27 }
 0x30a   : > { %v1735_v28 = vpop.xlane.xlu1 %1734 }
 0x30b   : > { %2904 = vrcp.f32 %v1735_v28 }
 0x30e   : > { %v1738_v29 = vpop.xlane.xlu0 %1737 }
 0x30f   : > { %2906 = vrcp.f32 %v1738_v29 }
 0x311   : > { %v2903_v31 = vpop.eup %2902 }
 0x312   : > { %v1746_v32 = vmul.f32 %v2903_v31, %v2895_v18  ;;  %v1741_v33 = vpop.xlane.xlu1 %1740 }
 0x313   : > { %2908 = vrcp.f32 %v1741_v33 }
 0x314   : > { %2743 = vmatmul.mubr.msk.f32.vlgmr.msra.gmra.mrb[16].mxu0 %vm1401_vm2, %v1746_v32 }
 0x315   : > { %v2905_v36 = vpop.eup %2904  ;;  %2751 = vmatpush3.msra.mxu0 %v1328_v34  ;;  %2752 = vmatprep.mubr.msk.f32.mxu0 %vm2975_vm0, %v2976_v11 }
 0x316   : > { %v1747_v37 = vmul.f32 %v2905_v36, %v2897_v21  ;;  %2760 = vmatprep.subr.mxu0 %v2976_v11 }
 0x318   : > { %2748 = vmatmul.mubr.msk.f32.vlgmr.msra.gmra.mrb[16].mxu1 %vm1401_vm2, %v1747_v37 }
 0x319   : > { %v2907_v39 = vpop.eup %2906  ;;  %2756 = vmatpush3.msra.mxu1 %v1398_v38  ;;  %2757 = vmatprep.mubr.msk.f32.mxu1 %vm2975_vm0, %v2976_v11 }
 0x31a   : > { %v1748_v40 = vmul.f32 %v2907_v39, %v2899_v23  ;;  %2765 = vmatprep.subr.mxu1 %v2976_v11 }
 0x31c   : > { %2753 = vmatmul.mubr.msk.f32.vlgmr.msra.gmra.mrb[18].mxu0 %vm1401_vm2, %v1748_v40 }
 0x31d   : > { %v2909_v41 = vpop.eup %2908  ;;  %2762 = vmatprep.mubr.msk.f32.mxu0 %vm2975_vm0, %v2976_v11  ;;  %2761 = vmatpush3.msra.mxu0 %v2042_v43 }
 0x31e   : > { %v1749_v42 = vmul.f32 %v2909_v41, %v2901_v25  ;;  %2770 = vmatprep.subr.mxu0 %v2976_v11 }
 0x320   : > { %2758 = vmatmul.mubr.msk.f32.vlgmr.msra.gmra.mrb[18].mxu1 %vm1401_vm2, %v1749_v42 }
 0x321   : > { %2767 = vmatprep.mubr.msk.f32.mxu1 %vm2975_vm0, %v2976_v11  ;;  %2766 = vmatpush3.msra.mxu1 %v2043_v44 }
 0x322   : > { %2775 = vmatprep.subr.mxu1 %v2976_v11 }
 0x3e7   : > { %v1819_v46 = vpop.f32.mrb[16].mxu0 }
 0x3e8   : > { %v2744_v47 = vpop.f32.mrb[17].mxu0  ;;  %2763 = vmatmul.mubr.msk.f32.vlgmr.msra.gmra.mrb[20].mxu0 %vm1401_vm2, %v1819_v46 }
 0x3e9   : > { %2771 = vmatpush3.msra.mxu0 %v2044_v45  ;;  %2772 = vmatprep.mubr.msk.f32.mxu0 %vm2975_vm0, %v2976_v11 }
 0x3eb   : > { %v1892_v49 = vpop.f32.mrb[16].mxu1 }
 0x3ec   : > { %v2749_v50 = vpop.f32.mrb[17].mxu1  ;;  %2768 = vmatmul.mubr.msk.f32.vlgmr.msra.gmra.mrb[20].mxu1 %vm1401_vm2, %v1892_v49 }
 0x3ed   : > { %2776 = vmatpush3.msra.mxu1 %v2045_v48  ;;  %2777 = vmatprep.mubr.msk.f32.mxu1 %vm2975_vm0, %v2976_v11 }
 0x3ef   : > { %v1965_v51 = vpop.f32.mrb[18].mxu0 }
 0x3f0   : > { %v2754_v52 = vpop.f32.mrb[19].mxu0  ;;  %2773 = vmatmul.mubr.msk.f32.vlgmr.msra.gmra.mrb[22].mxu0 %vm1401_vm2, %v1965_v51 }
 0x3f3   : > { %v2038_v53 = vpop.f32.mrb[18].mxu1 }
 0x3f4   : > { %v2759_v54 = vpop.f32.mrb[19].mxu1  ;;  %2778 = vmatmul.mubr.msk.f32.vlgmr.msra.gmra.mrb[22].mxu1 %vm1401_vm2, %v2038_v53 }
 0x4bb   : > { %v2115_v55 = vpop.f32.mrb[20].mxu0 }
 0x4bc   : > { %v2764_v56 = vpop.f32.mrb[21].mxu0  ;;  %v2338_v58 = vsel %vm461_vm1, %v2115_v55, 0.0 }
 0x4bf   : > { %v2188_v57 = vpop.f32.mrb[20].mxu1 }
 0x4c0   : > { %v2339_v59 = vsel %vm461_vm1, %v2188_v57, 0.0  ;;  %v2769_v60 = vpop.f32.mrb[21].mxu1 }
 0x4c1   : > { %v2340_v61 = vadd.f32 %v2339_v59, %v2338_v58 }
 0x4c3   : > { %v2261_v11 = vpop.f32.mrb[22].mxu0 }
 0x4c4   : > { %v2341_v62 = vsel %vm461_vm1, %v2261_v11, 0.0  ;;  %v2774_v63 = vpop.f32.mrb[23].mxu0 }
 0x4c5   : > { %v2342_v0 = vadd.f32 %v2341_v62, %v2340_v61 }
 0x4c7   : > { %v2334_v1 = vpop.f32.mrb[22].mxu1 }
 0x4c8   : > { %v2343_v2 = vsel %vm461_vm1, %v2334_v1, 0.0  ;;  %v2779_v5 = vpop.f32.mrb[23].mxu1 }
 0x4c9   : > { %v2344_v6 = vadd.f32 %v2343_v2, %v2342_v0 }
 0x4cb   : > { %v2352_v7 = vadd.f32 %v2499_v4, %v2344_v6 }
 0x4cd   : > { %2353 = vst.msk [vmem:[%s403_s15] sm:$0xff] %vm461_vm1, %v2352_v7 }
 0x4ce   : > { %2923 = shalt.err (!%p2920_p3)
}
 0x4cf   : > { %s2924_s14 = scalar_lea.hbm %s3429_s30, 128  ;;  %s2928_s15 = scalar_lea.hbm %s3483_s11, 256 }
 0x4d0   : > { %p2925_p4 = scmp.ne.s32.totalorder %s3429_s30, %s2924_s14  ;;  %p2929_p9 = scmp.lt.u32.totalorder %s3429_s30, %s3483_s11 }
 0x4d1   : > { %p2930_p10 = scmp.lt.u32.totalorder %s2928_s15, %s2924_s14  ;;  %p2932_p12 = scmp.lt.u32.totalorder %s2924_s14, %s3429_s30 }
 0x4d2   : > { %p2926_p7 = pnand %p2925_p4, %p3076_p5 }
 0x4d3   : > { %p2931_p11 = por %p2930_p10, %p2929_p9 }
 0x4d4   : > { %p2927_p8 = pneg %p2926_p7 }
 0x4d5   : > { %p2933_p13 = por %p2932_p12, %p2931_p11 }
 0x4d7   : > { %p2934_p0 = pnand %p2933_p13, %p2927_p8 }
 0x4d9   : > { %2937 = shalt.err (!%p2934_p0)
}
 0x4da   : > { %2852 = dma.vmem_to_hbm [thread:$0]  (%p3076_p5), %s3431_s22, 128, %s3429_s30, %s2355_s16  }
 0x4db PF: > { %p2858_p1 = scmp.ge.s32.totalorder %s2972_s20, 2  ;;  %s2380_s25 = sand.u32 1, %s2960_s17  }
 0x4dc   : > { %s2381_s21 = scalar_lea.sflag [#allocation3], %s2380_s25 }
 0x4dd   : > { %p2855_p2 = pnand %p2858_p1, %p3080_p6 }
 0x4df   : > { %2955 = dma.done.wait (!%p2855_p2), %s2381_s21, 128  }
 0x4e0   : > { %2957 = vsyncadd (!%p2855_p2), %s2381_s21, 4294967168  ;;  %s3489_s29 = sld [smem:[#allocation5_spill]]  ;;  %p21_p3 = scmp.ge.s32.totalorder %s3063_s23, 4  }
 0x4e1   : > { %s3490_s17 = smov %s2964_s18  ;;  %s3491_s18 = smov %s2968_s19 }
 0x4e2   : > { %s3493_s20 = smov %s3063_s23  ;;  %23 = sbr.rel (!%p21_p3) target bundleno = 5 (0x5), region = 105 }
 0x4e6   : > { %s3492_s19 = smov %s3489_s29 }
 0x4e9   :  { %2386 = vsyncpa [#allocation3], 1 }
 0x4ea   :  { %2388 = vsyncpa [#allocation3 + $0x1], 1 }

</bundles_post_ra>
